<compile_context>
chip_gen: v6e
topology: v6e:2x2x1
jax: 0.10.0
libtpu: 0.0.40
codegen_flags: <defaults>
</compile_context>

<pallas_src>
import jax
import jax.numpy as jnp
from jax.experimental import pallas as pl
from jax.experimental.pallas import tpu as pltpu


def fused_encode_pool_kernel(ids_ref, table_ref, w_ref, b_ref, pool_ref, out_ref):
    """One batch-block:
       ids_ref   : [1, TB*S, 1]   int32    token ids for TB batch rows (flattened)
       table_ref : [V, H]         bfloat16 embedding table (shared)
       w_ref     : [H, H]         bfloat16 dense weight   (shared)
       b_ref     : [1, H]         float32  dense bias     (shared)
       pool_ref  : [1, TB, TB*S]  float32  block-diag masked-mean pooling matrix
       out_ref   : [1, TB, H]     float32  pooled embeddings
    """
    tbs = ids_ref.shape[1]
    vocab = table_ref.shape[0]

    # --- fused embedding gather: one-hot(ids) @ table on the MXU -----------
    ids_col = ids_ref[0]                                            # [TB*S, 1]
    vocab_iota = jax.lax.broadcasted_iota(jnp.int32, (tbs, vocab), 1)
    one_hot = (ids_col == vocab_iota).astype(jnp.bfloat16)          # [TB*S, V]
    emb = jnp.dot(one_hot, table_ref[...],
                  preferred_element_type=jnp.float32)               # [TB*S, H]

    # --- encoder hot path: dense + GELU (f32 accumulation, f32 epilogue) ---
    hidden = jnp.dot(emb.astype(jnp.bfloat16), w_ref[...],
                     preferred_element_type=jnp.float32) + b_ref[...]
    hidden = jax.nn.gelu(hidden)                                    # [TB*S, H]

    # --- masked mean pooling as a single MXU contraction -------------------
    # pool_ref already carries mask[b, s] / clamp(sum_s mask[b, s], 1e-9)
    # on its block-diagonal, so this dot IS the masked mean.
    out_ref[0] = jnp.dot(pool_ref[0], hidden,
                         preferred_element_type=jnp.float32)        # [TB, H]


def _choose_tb(batch, seq):
    """Largest divisor of `batch` such that TB*S targets >=256 MXU rows."""
    target = max(1, pl.cdiv(256, seq))
    tb = min(batch, target)
    while batch % tb:
        tb -= 1
    return tb


def embedding_model_forward(ids, mask, emb_table, w, b, *, tb=None):
    """ids: [B, S] int32, mask: [B, S] {0,1}.  Returns pooled [B, H] float32."""
    B, S = ids.shape
    V, H = emb_table.shape
    if tb is None:
        tb = _choose_tb(B, S)
    assert B % tb == 0
    G = B // tb
    tbs = tb * S

    # ---- layout plumbing in the wrapper (O(B*S), negligible) --------------
    # ids as a per-group column so the kernel builds a lane-major one-hot
    # without any in-kernel reshape.
    ids_col = ids.astype(jnp.int32).reshape(G, tbs, 1)

    # Fold mean-pooling weights (mask / clamp(sum mask, 1e-9)) into a
    # block-diagonal [TB, TB*S] matrix per group -> pooling is one MXU matmul.
    maskf = mask.astype(jnp.float32)                                # [B, S]
    denom = jnp.maximum(jnp.sum(maskf, axis=-1, keepdims=True), 1e-9)
    pool_w = (maskf / denom).reshape(G, 1, tbs)                     # [G, 1, TB*S]
    sel = (jnp.arange(tb)[:, None] == (jnp.arange(tbs)[None, :] // S))
    pool_mat = sel.astype(jnp.float32)[None] * pool_w               # [G, TB, TB*S]

    # bf16 inputs for the MXU, f32 bias / accumulation.
    table_bf16 = emb_table.astype(jnp.bfloat16)
    w_bf16 = w.astype(jnp.bfloat16)
    bias = b.astype(jnp.float32).reshape(1, H)

    out = pl.pallas_call(
        fused_encode_pool_kernel,
        out_shape=jax.ShapeDtypeStruct((G, tb, H), jnp.float32),
        grid_spec=pltpu.PrefetchScalarGridSpec(
            num_scalar_prefetch=0,
            grid=(G,),
            in_specs=[
                pl.BlockSpec((1, tbs, 1), lambda g: (g, 0, 0)),   # ids
                pl.BlockSpec((V, H), lambda g: (0, 0)),           # emb table
                pl.BlockSpec((H, H), lambda g: (0, 0)),           # dense W
                pl.BlockSpec((1, H), lambda g: (0, 0)),           # dense b
                pl.BlockSpec((1, tb, tbs), lambda g: (g, 0, 0)),  # pooling mat
            ],
            out_specs=pl.BlockSpec((1, tb, H), lambda g: (g, 0, 0)),
        ),
        compiler_params=pltpu.CompilerParams(
            dimension_semantics=("parallel",)),
    )(ids_col, table_bf16, w_bf16, bias, pool_mat)

    return out.reshape(B, H)


def reference_forward(ids, mask, emb_table, w, b):
    """Pure-JAX f32 reference matching the PyTorch 'mean' pooling branch."""
    emb = jnp.take(emb_table, ids, axis=0).astype(jnp.float32)
    hidden = jax.nn.gelu(jnp.einsum('bsh,hk->bsk', emb, w) + b[None, None, :])
    m = mask.astype(jnp.float32)[:, :, None]
    s = jnp.sum(hidden * m, axis=1)
    d = jnp.maximum(jnp.sum(m, axis=1), 1e-9)
    return s / d


if __name__ == "__main__":
    B, S, H, VOCAB = 2, 8, 32, 100

    key = jax.random.PRNGKey(0)
    k_ids, k_emb, k_w, k_b = jax.random.split(key, 4)

    ids = jax.random.randint(k_ids, (B, S), 0, VOCAB, dtype=jnp.int32)
    # variable-length mask: row 0 full length, row 1 has padding
    lengths = jnp.array([S, 5], dtype=jnp.int32)
    mask = (jnp.arange(S)[None, :] < lengths[:, None]).astype(jnp.int32)

    emb_table = jax.random.normal(k_emb, (VOCAB, H), dtype=jnp.float32) * 0.02
    w = jax.random.normal(k_w, (H, H), dtype=jnp.float32) * 0.05
    b = jax.random.normal(k_b, (H,), dtype=jnp.float32) * 0.01

    pooled = embedding_model_forward(ids, mask, emb_table, w, b)
    pooled = jax.block_until_ready(pooled)

    ref = reference_forward(ids, mask, emb_table, w, b)
    assert pooled.shape == (B, H)
    # Kernel uses bf16 table/weight inputs (f32 accumulation) vs the pure-f32
    # reference, so the tolerance is loosened accordingly.
    assert jnp.allclose(pooled, ref, atol=2e-3, rtol=2e-2), "mismatch vs reference"

    print("KERNEL_OK")
</pallas_src>

<mosaic_0001>
module attributes {stable_mosaic.version = 11 : i64} {
  func.func @fused_encode_pool_kernel(%arg0: i32, %arg1: memref<1x16x1xi32, #tpu.memory_space<vmem>>, %arg2: memref<100x32xbf16, #tpu.memory_space<vmem>>, %arg3: memref<32x32xbf16, #tpu.memory_space<vmem>>, %arg4: memref<1x32xf32, #tpu.memory_space<vmem>>, %arg5: memref<1x2x16xf32, #tpu.memory_space<vmem>>, %arg6: memref<1x2x32xf32, #tpu.memory_space<vmem>>) attributes {dimension_semantics = [#tpu.dimension_semantics<parallel>], iteration_bounds = array<i64: 1>, scalar_prefetch = 0 : i64, scratch_operands = 0 : i64, tpu.core_type = #tpu.core_type<tc>, window_params = [{transform_indices = @transform_0, window_bounds = array<i64: 1, 16, 1>}, {pipeline_mode = #tpu.pipeline_mode<synchronous>, transform_indices = @transform_1, window_bounds = array<i64: 100, 32>}, {pipeline_mode = #tpu.pipeline_mode<synchronous>, transform_indices = @transform_2, window_bounds = array<i64: 32, 32>}, {pipeline_mode = #tpu.pipeline_mode<synchronous>, transform_indices = @transform_3, window_bounds = array<i64: 1, 32>}, {transform_indices = @transform_4, window_bounds = array<i64: 1, 2, 16>}, {transform_indices = @transform_5, window_bounds = array<i64: 1, 2, 32>}]} {
    %c0 = arith.constant 0 : index
    %c0_0 = arith.constant 0 : index
    %c0_1 = arith.constant 0 : index
    %0 = vector.load %arg1[%c0, %c0_0, %c0_1] : memref<1x16x1xi32, #tpu.memory_space<vmem>>, vector<1x16x1xi32>
    %1 = vector.shape_cast %0 : vector<1x16x1xi32> to vector<16x1xi32>
    %2 = tpu.iota {dimensions = array<i32: 1>} : vector<16x100xi32>
    %3 = vector.broadcast %1 : vector<16x1xi32> to vector<16x100xi32>
    %4 = arith.cmpi eq, %3, %2 : vector<16x100xi32>
    %5 = arith.extui %4 : vector<16x100xi1> to vector<16x100xi32>
    %6 = arith.sitofp %5 : vector<16x100xi32> to vector<16x100xf32>
    %7 = arith.truncf %6 : vector<16x100xf32> to vector<16x100xbf16>
    %c0_2 = arith.constant 0 : index
    %c0_3 = arith.constant 0 : index
    %8 = vector.load %arg2[%c0_2, %c0_3] : memref<100x32xbf16, #tpu.memory_space<vmem>>, vector<100x32xbf16>
    %cst = arith.constant dense<0.000000e+00> : vector<16x32xf32>
    %9 = tpu.matmul %7, %8, %cst {dimension_numbers = #tpu.dot_dimension_numbers<[1], [0], [0], [1], [0, 0, 1, 1], [], []>} : vector<16x100xbf16>, vector<100x32xbf16>, vector<16x32xf32> -> vector<16x32xf32>
    %10 = arith.truncf %9 : vector<16x32xf32> to vector<16x32xbf16>
    %c0_4 = arith.constant 0 : index
    %c0_5 = arith.constant 0 : index
    %11 = vector.load %arg3[%c0_4, %c0_5] : memref<32x32xbf16, #tpu.memory_space<vmem>>, vector<32x32xbf16>
    %cst_6 = arith.constant dense<0.000000e+00> : vector<16x32xf32>
    %12 = tpu.matmul %10, %11, %cst_6 {dimension_numbers = #tpu.dot_dimension_numbers<[1], [0], [0], [1], [0, 0, 1, 1], [], []>} : vector<16x32xbf16>, vector<32x32xbf16>, vector<16x32xf32> -> vector<16x32xf32>
    %c0_7 = arith.constant 0 : index
    %c0_8 = arith.constant 0 : index
    %13 = vector.load %arg4[%c0_7, %c0_8] : memref<1x32xf32, #tpu.memory_space<vmem>>, vector<1x32xf32>
    %14 = vector.broadcast %13 : vector<1x32xf32> to vector<16x32xf32>
    %15 = arith.addf %12, %14 : vector<16x32xf32>
    %16 = arith.mulf %15, %15 : vector<16x32xf32>
    %17 = arith.mulf %15, %16 : vector<16x32xf32>
    %cst_9 = arith.constant 4.471500e-02 : f32
    %18 = vector.broadcast %cst_9 : f32 to vector<16x32xf32>
    %19 = arith.mulf %18, %17 : vector<16x32xf32>
    %20 = arith.addf %15, %19 : vector<16x32xf32>
    %cst_10 = arith.constant 0.797884583 : f32
    %21 = vector.broadcast %cst_10 : f32 to vector<16x32xf32>
    %22 = arith.mulf %21, %20 : vector<16x32xf32>
    %23 = math.tanh %22 : vector<16x32xf32>
    %cst_11 = arith.constant 1.000000e+00 : f32
    %24 = vector.broadcast %cst_11 : f32 to vector<16x32xf32>
    %25 = arith.addf %24, %23 : vector<16x32xf32>
    %cst_12 = arith.constant 5.000000e-01 : f32
    %26 = vector.broadcast %cst_12 : f32 to vector<16x32xf32>
    %27 = arith.mulf %26, %25 : vector<16x32xf32>
    %28 = arith.mulf %15, %27 : vector<16x32xf32>
    %c0_13 = arith.constant 0 : index
    %c0_14 = arith.constant 0 : index
    %c0_15 = arith.constant 0 : index
    %29 = vector.load %arg5[%c0_13, %c0_14, %c0_15] : memref<1x2x16xf32, #tpu.memory_space<vmem>>, vector<1x2x16xf32>
    %30 = vector.shape_cast %29 : vector<1x2x16xf32> to vector<2x16xf32>
    %cst_16 = arith.constant dense<0.000000e+00> : vector<2x32xf32>
    %31 = tpu.matmul %30, %28, %cst_16 {dimension_numbers = #tpu.dot_dimension_numbers<[1], [0], [0], [1], [0, 0, 1, 1], [], []>} : vector<2x16xf32>, vector<16x32xf32>, vector<2x32xf32> -> vector<2x32xf32>
    %c0_17 = arith.constant 0 : index
    %c0_18 = arith.constant 0 : index
    %c0_19 = arith.constant 0 : index
    %32 = vector.load %arg6[%c0_17, %c0_18, %c0_19] : memref<1x2x32xf32, #tpu.memory_space<vmem>>, vector<1x2x32xf32>
    %33 = vector.shape_cast %32 : vector<1x2x32xf32> to vector<2x32xf32>
    %34 = vector.shape_cast %31 : vector<2x32xf32> to vector<1x2x32xf32>
    tpu.vector_store %arg6[%c0_17, %c0_18, %c0_19], %34 {strides = array<i32>} : memref<1x2x32xf32, #tpu.memory_space<vmem>>, vector<1x2x32xf32>,
    return
  }
  func.func @transform_0(%arg0: i32) -> (i32, i32, i32) {
    %c0_i32 = arith.constant 0 : i32
    %c0_i32_0 = arith.constant 0 : i32
    %c0_i32_1 = arith.constant 0 : i32
    return %arg0, %c0_i32, %c0_i32_0 : i32, i32, i32
  }
  func.func @transform_1(%arg0: i32) -> (i32, i32) {
    %c0_i32 = arith.constant 0 : i32
    %c0_i32_0 = arith.constant 0 : i32
    %c0_i32_1 = arith.constant 0 : i32
    return %c0_i32, %c0_i32_0 : i32, i32
  }
  func.func @transform_2(%arg0: i32) -> (i32, i32) {
    %c0_i32 = arith.constant 0 : i32
    %c0_i32_0 = arith.constant 0 : i32
    %c0_i32_1 = arith.constant 0 : i32
    return %c0_i32, %c0_i32_0 : i32, i32
  }
  func.func @transform_3(%arg0: i32) -> (i32, i32) {
    %c0_i32 = arith.constant 0 : i32
    %c0_i32_0 = arith.constant 0 : i32
    %c0_i32_1 = arith.constant 0 : i32
    return %c0_i32, %c0_i32_0 : i32, i32
  }
  func.func @transform_4(%arg0: i32) -> (i32, i32, i32) {
    %c0_i32 = arith.constant 0 : i32
    %c0_i32_0 = arith.constant 0 : i32
    %c0_i32_1 = arith.constant 0 : i32
    return %arg0, %c0_i32, %c0_i32_0 : i32, i32, i32
  }
  func.func @transform_5(%arg0: i32) -> (i32, i32, i32) {
    %c0_i32 = arith.constant 0 : i32
    %c0_i32_0 = arith.constant 0 : i32
    %c0_i32_1 = arith.constant 0 : i32
    return %arg0, %c0_i32, %c0_i32_0 : i32, i32, i32
  }
}

</mosaic_0001>

<bundles_post_ra>
// kernel: tpu_custom_call.1
= control target key start
LH: loop header
LB: loop body
LE: loop exit
PB: predicated region body
PF: predicated region fallthrough
CT: control target
= control target key end

     0   :  { %v420_v1 = vmov 0   ;;  %v421_v2 = vmov 0.0   ;;  %vm95_vm0 = vcmask 1041408   ;;  %vm422_vm1 = vmmov 0   ;;  %s515_s0 = inlined_call_operand.vmem [shape: s32[1,16,1], index: 0, kind: input, shape index: {}]   ;;  %s516_s1 = inlined_call_operand.vmem [shape: bf16[100,32], index: 1, kind: input, shape index: {}]   ;;  %s517_s2 = inlined_call_operand.vmem [shape: bf16[32,32], index: 2, kind: input, shape index: {}]   ;;  %s518_s3 = inlined_call_operand.vmem [shape: f32[1,32], index: 3, kind: input, shape index: {}]   ;;  %s519_s4 = inlined_call_operand.vmem [shape: f32[1,2,16], index: 4, kind: input, shape index: {}]   ;;  %s520_s5 = inlined_call_operand.hbm [shape: f32[1,2,32], index: 5, kind: output, shape index: {}]  }
   0x1   :  { %v22_v0 = vld [vmem:[%s515_s0] sm:$0xff]  ;;  %384 = vset.pattern.permute.xlu0 %v420_v1  ;;  %347 = vmatprep.subr.bf16.mxu0 %v421_v2  ;;  %v385_v3 = vld [vmem:[%s516_s1 + $0x30] ss:$0 sps:$4 sm:$0x33]   ;;  %v23_v4 = vld [vmem:[%s515_s0 + $0x8] sm:$0xff] }
   0x2   :  { %27 = vperm.xlu0 %384, %v22_v0   ;;  %365 = vmatprep.subr.bf16.mxu1 %v421_v2  ;;  %v97_v5 = vsel %vm95_vm0, %v385_v3, 0  ;;  %v386_v6 = vld [vmem:[%s516_s1 + $0x28] sm:$0xff]   ;;  %v387_v7 = vld [vmem:[%s516_s1 + $0x20] sm:$0xff]  }
   0x3   :  { %348 = vmatpush3.bf16.msra.mxu0 %v97_v5  ;;  %361 = vmatprep.mubr.msk.bf16.mxu0 %vm422_vm1, %v421_v2 }
   0x4   :  { %349 = vmatprep.subr.bf16.mxu0 %v421_v2  ;;  %369 = vmatprep.mubr.msk.bf16.mxu1 %vm422_vm1, %v421_v2 }
   0x6   :  { %30 = vperm.xlu0 %384, %v23_v4  }
   0x7   :  { %350 = vmatpush3.bf16.msra.mxu0 %v386_v6 }
   0x8   :  { %351 = vmatprep.subr.bf16.mxu0 %v421_v2 }
   0x9   :  { %10 = vsyncpa [#allocation3], 0  ;;  %v388_v8 = vld [vmem:[%s516_s1 + $0x18] sm:$0xff]   ;;  %v389_v9 = vld [vmem:[%s516_s1 + $0x10] sm:$0xff]   ;;  %v24_v12 = vlaneseq  ;;  %vm91_vm4 = vcmask 818176   ;;  %vm164_vm5 = vcmask 261120  }
   0xa   :  { %v390_v10 = vld [vmem:[%s516_s1 + $0x8] sm:$0xff]   ;;  %v391_v11 = vld [vmem:[%s516_s1] sm:$0xff]   ;;  %vm228_vm6 = vcmask 130048   ;;  %s423_s15 = smov [#allocation2]   ;;  %vm302_vm7 = vcmask 254976  }
   0xb   :  { %352 = vmatpush3.bf16.msra.mxu0 %v387_v7  ;;  %v25_v13 = vand.u32 127, %v24_v12  ;;  %v392_v19 = vld [vmem:[%s517_s2 + $0x8] sm:$0xff]   ;;  %v393_v20 = vld [vmem:[%s517_s2] sm:$0xff]   ;;  %s310_s16 = sshll.u32 %s423_s15, 4  ;;  %s311_s16 = int_to_ptr.vmem [resolvable:$true] %s310_s16 }
   0xc   :  { %353 = vmatprep.subr.bf16.mxu0 %v421_v2  ;;  %366 = vmatpush3.bf16.msra.mxu1 %v392_v19  ;;  %v328_v26 = vld [vmem:[%s518_s3] ss:$0 sm:$0xff]  ;;  %s398_s17 = scalar_lea.vmem %s311_s16, 32  ;;  %p403_p1 = scmp.lt.s32.totalorder %s311_s16, %s311_s16 }
   0xd   :  { %367 = vmatprep.subr.bf16.mxu1 %v421_v2  ;;  %v227_v51 = vld [vmem:[%s519_s4] sm:$0x3]  ;;  %p399_p0 = scmp.ne.s32.totalorder %s311_s16, %s398_s17  ;;  %p404_p2 = scmp.lt.s32.totalorder %s398_s17, %s398_s17 }
   0xf   :  { %354 = vmatpush3.bf16.msra.mxu0 %v388_v8  ;;  %p405_p3 = por %p404_p2, %p403_p1 }
  0x10   :  { %355 = vmatprep.subr.bf16.mxu0 %v421_v2  ;;  %368 = vmatpush3.bf16.msra.mxu1 %v393_v20 }
  0x11   :  { %373 = vmatprep.subr.mxu1 %v421_v2  ;;  %p406_p4 = pnand %p405_p3, %p399_p0 }
  0x13   :  { %356 = vmatpush3.bf16.msra.mxu0 %v389_v9 }
  0x14   :  { %357 = vmatprep.subr.bf16.mxu0 %v421_v2 }
  0x17   :  { %358 = vmatpush3.bf16.msra.mxu0 %v390_v10 }
  0x18   :  { %359 = vmatprep.subr.bf16.mxu0 %v421_v2 }
  0x1b   :  { %360 = vmatpush3.bf16.msra.mxu0 %v391_v11 }
  0x7d   :  { %v28_v14 = vpop.permute.xlu0 %27 }
  0x7e   :  { %vm32_vm2 = vcmp.eq.s32.totalorder %v28_v14, %v25_v13 }
  0x7f   :  { %v318_v16 = vsel %vm32_vm2, 1.0, %v421_v2 }
  0x81   :  { %v31_v15 = vpop.permute.xlu0 %30 }
  0x82   :  { %vm33_vm3 = vcmp.eq.s32.totalorder %v31_v15, %v25_v13 }
  0x83   :  { %v319_v17 = vsel %vm33_vm3, 1.0, %v421_v2 }
  0x84   :  { %v38_v18 = vpack.c.bf16 %v319_v17, %v318_v16 }
  0x86   :  { %362 = vmatmul.mubr.msk.bf16.vlgmr.msra.gmra.mxu0 %vm91_vm4, %v38_v18 }
 0x146   :  { %v133_v21 = vpop.f32.mrf.mxu0 }
 0x148   :  { %v363_v22 = vpop.f32.mrf.mxu0 }
 0x14a   :  { %v136_v23 = vpop.f32.mrf.mxu0 }
 0x14b   :  { %v140_v24 = vpack.c.bf16 %v136_v23, %v133_v21 }
 0x14c   :  { %v364_v25 = vpop.f32.mrf.mxu0 }
 0x14d   :  { %370 = vmatmul.mubr.msk.bf16.vlgmr.msra.gmra.mxu1 %vm164_vm5, %v140_v24 }
 0x14e   :  { %377 = vmatprep.mubr.msk.f32.mxu1 %vm422_vm1, %v421_v2 }
 0x20d   :  { %v202_v27 = vpop.f32.mrf.mxu1 }
 0x20e   :  { %v203_v28 = vadd.f32 %v328_v26, %v202_v27 }
 0x20f   :  { %v371_v29 = vpop.f32.mrf.mxu1 }
 0x210   :  { %v209_v30 = vmul.f32 %v203_v28, %v203_v28 }
 0x211   :  { %v205_v31 = vpop.f32.mrf.mxu1 }
 0x212   :  { %v211_v32 = vmul.f32 %v209_v30, %v203_v28  ;;  %v206_v33 = vadd.f32 %v328_v26, %v205_v31 }
 0x213   :  { %v372_v34 = vpop.f32.mrf.mxu1 }
 0x214   :  { %v213_v35 = vmul.f32 0.044715, %v211_v32  ;;  %v210_v36 = vmul.f32 %v206_v33, %v206_v33 }
 0x216   :  { %v215_v37 = vadd.f32 %v213_v35, %v203_v28  ;;  %v212_v38 = vmul.f32 %v210_v36, %v206_v33 }
 0x218   :  { %v217_v39 = vmul.f32 0.7978846, %v215_v37  ;;  %v214_v40 = vmul.f32 0.044715, %v212_v38 }
 0x21a   :  { %394 = vtanh.f32 %v217_v39  ;;  %v216_v41 = vadd.f32 %v214_v40, %v206_v33 }
 0x21c   :  { %v218_v42 = vmul.f32 0.7978846, %v216_v41 }
 0x21e   :  { %396 = vtanh.f32 %v218_v42 }
 0x227   :  { %v395_v43 = vpop.eup %394 }
 0x228   :  { %v221_v44 = vadd.f32 1.0, %v395_v43 }
 0x22a   :  { %v223_v48 = vmul.f32 0.5, %v221_v44 }
 0x22b   :  { %v397_v45 = vpop.eup %396 }
 0x22c   :  { %v222_v46 = vadd.f32 1.0, %v397_v45  ;;  %v225_v50 = vmul.f32 %v223_v48, %v203_v28 }
 0x22e   :  { %v224_v47 = vmul.f32 0.5, %v222_v46 }
 0x230   :  { %v226_v49 = vmul.f32 %v224_v47, %v206_v33 }
 0x232   :  { %374 = vmatpush3.msra.mxu1 %v226_v49 }
 0x233   :  { %375 = vmatprep.subr.mxu1 %v421_v2 }
 0x234   :  { %376 = vmatpush3.msra.mxu1 %v225_v50 }
 0x235   :  { %378 = vmatmul.mubr.msk.f32.vlgmr.msra.gmra.mxu1 %vm228_vm6, %v227_v51 }
 0x2f5   :  { %v298_v52 = vpop.f32.mrf.mxu1 }
 0x2f6   :  { %303 = vst.msk [vmem:[#allocation2] sm:$0x3] %vm302_vm7, %v298_v52 }
 0x2f7   :  { %v379_v53 = vpop.f32.mrf.mxu1 }
 0x2f8   :  { %409 = shalt.err (!%p406_p4)
}
 0x2f9   :  { %313 = dma.vmem_to_hbm [thread:$0]  %s311_s16, 32, %s520_s5, [#allocation3]  }
 0x2fa   :  { %418 = dma.done.wait [#allocation3], 32  }
 0x2fb   :  { %419 = vsyncadd [#allocation3], 4294967264 }
 0x2fc   :  { %317 = vsyncpa [#allocation3], 1 }

</bundles_post_ra>
